<compile_context>
chip_gen: v5e
topology: v5e:2x2
jax: 0.10.0
libtpu: 0.0.40
codegen_flags: <defaults>
</compile_context>

<pallas_src>
import jax
import jax.numpy as jnp
from jax.experimental import pallas as pl
from jax.experimental.pallas import tpu as pltpu


def dqn_mlp_kernel(x_ref, w1_ref, b1_ref, w2_ref, b2_ref, w3_ref, b3_ref, o_ref):
    # Layer 1: bf16 MXU matmul, f32 accumulate; bias + ReLU in f32 on the VPU.
    h1 = jnp.dot(x_ref[...], w1_ref[...], preferred_element_type=jnp.float32)
    h1 = jnp.maximum(h1 + b1_ref[...], 0.0)

    # Layer 2.
    h2 = jnp.dot(h1.astype(jnp.bfloat16), w2_ref[...], preferred_element_type=jnp.float32)
    h2 = jnp.maximum(h2 + b2_ref[...], 0.0)

    # Layer 3: raw Q-values. Output is padded to 128 lanes -> unmasked, lane-dense store.
    q = jnp.dot(h2.astype(jnp.bfloat16), w3_ref[...], preferred_element_type=jnp.float32)
    o_ref[...] = (q + b3_ref[...]).astype(o_ref.dtype)


def _round_up(n, m):
    return ((n + m - 1) // m) * m


def dqn_forward(x, params, *, block_batch=256):
    """DQN MLP forward as one batch-tiled Pallas call. Handles any batch / num_actions
    by padding to TPU-friendly tile shapes and slicing the result back."""
    w1, b1, w2, b2, w3, b3 = params
    batch, input_size = x.shape
    hidden = w1.shape[1]
    num_actions = w3.shape[1]

    # --- Lane-dense output: pad num_actions up to a multiple of 128 lanes. ---
    n_pad = max(128, _round_up(num_actions, 128))
    if n_pad != num_actions:
        w3 = jnp.pad(w3, ((0, 0), (0, n_pad - num_actions)))
        b3 = jnp.pad(b3, ((0, 0), (0, n_pad - num_actions)))

    # --- Batch tile: multiple of 8 sublanes, capped at block_batch (MXU-friendly). ---
    tb = min(block_batch, _round_up(batch, 8))
    batch_pad = _round_up(batch, tb)
    if batch_pad != batch:
        x = jnp.pad(x, ((0, batch_pad - batch), (0, 0)))

    # --- bf16 matmul operands (native MXU rate on v6e/v7x, halves DMA bytes). ---
    xb = x.astype(jnp.bfloat16)
    w1b = w1.astype(jnp.bfloat16)
    w2b = w2.astype(jnp.bfloat16)
    w3b = w3.astype(jnp.bfloat16)

    grid = (batch_pad // tb,)

    # Constant index_map -> fetched once, stays resident in VMEM across grid steps.
    def const_spec(a):
        nd = a.ndim
        return pl.BlockSpec(a.shape, lambda i, _nd=nd: (0,) * _nd)

    flops = 2 * batch_pad * (input_size * hidden + hidden * hidden + hidden * n_pad)
    bytes_accessed = (
        xb.size * 2
        + (w1b.size + w2b.size + w3b.size) * 2
        + (b1.size + b2.size + b3.size) * 4
        + batch_pad * n_pad * 4
    )

    out = pl.pallas_call(
        dqn_mlp_kernel,
        out_shape=jax.ShapeDtypeStruct((batch_pad, n_pad), jnp.float32),
        grid=grid,
        in_specs=[
            pl.BlockSpec((tb, input_size), lambda i: (i, 0)),  # x: tiled over batch
            const_spec(w1b), const_spec(b1),
            const_spec(w2b), const_spec(b2),
            const_spec(w3b), const_spec(b3),
        ],
        out_specs=pl.BlockSpec((tb, n_pad), lambda i: (i, 0)),
        compiler_params=pltpu.CompilerParams(
            dimension_semantics=("parallel",),  # shard batch tiles across TCs on v7x
        ),
        cost_estimate=pl.CostEstimate(
            flops=flops, transcendentals=0, bytes_accessed=bytes_accessed
        ),
    )(xb, w1b, b1, w2b, b2, w3b, b3)

    return out[:batch, :num_actions]


def init_params(key, input_size, num_actions, hidden=128):
    """Deterministic PyTorch-style init: uniform(-1/sqrt(fan_in), 1/sqrt(fan_in))."""
    ks = jax.random.split(key, 6)

    def lin(kw, kb, fan_in, fan_out):
        bound = 1.0 / jnp.sqrt(jnp.float32(fan_in))
        w = jax.random.uniform(kw, (fan_in, fan_out), jnp.float32, -bound, bound)
        b = jax.random.uniform(kb, (1, fan_out), jnp.float32, -bound, bound)
        return w, b

    w1, b1 = lin(ks[0], ks[1], input_size, hidden)
    w2, b2 = lin(ks[2], ks[3], hidden, hidden)
    w3, b3 = lin(ks[4], ks[5], hidden, num_actions)
    return (w1, b1, w2, b2, w3, b3)


def dqn_forward_ref(x, params):
    """Pure-JAX f32 reference (matches the PyTorch module)."""
    w1, b1, w2, b2, w3, b3 = params
    h1 = jnp.maximum(x @ w1 + b1, 0.0)
    h2 = jnp.maximum(h1 @ w2 + b2, 0.0)
    return h2 @ w3 + b3


def dqn_forward_ref_bf16(x, params):
    """Pure-JAX reference mirroring the kernel's bf16-dot / f32-accumulate path."""
    w1, b1, w2, b2, w3, b3 = params
    bf = jnp.bfloat16
    h1 = jnp.dot(x.astype(bf), w1.astype(bf), preferred_element_type=jnp.float32)
    h1 = jnp.maximum(h1 + b1, 0.0)
    h2 = jnp.dot(h1.astype(bf), w2.astype(bf), preferred_element_type=jnp.float32)
    h2 = jnp.maximum(h2 + b2, 0.0)
    q = jnp.dot(h2.astype(bf), w3.astype(bf), preferred_element_type=jnp.float32)
    return q + b3


if __name__ == "__main__":
    key = jax.random.PRNGKey(0)
    k_x, k_p = jax.random.split(key)

    # MXU-friendly batch (multiple of 128); wrapper still handles arbitrary batch via padding.
    batch = 256
    input_size = 32
    num_actions = 4

    x = jax.random.normal(k_x, (batch, input_size), jnp.float32)
    params = init_params(k_p, input_size, num_actions)

    out = jax.block_until_ready(dqn_forward(x, params))

    ref_bf16 = dqn_forward_ref_bf16(x, params)
    ref_f32 = dqn_forward_ref(x, params)

    assert out.shape == (batch, num_actions), out.shape
    assert jnp.allclose(out, ref_bf16, atol=1e-2, rtol=1e-2), "mismatch vs bf16-mirrored reference"
    assert jnp.allclose(out, ref_f32, atol=5e-2, rtol=5e-2), "mismatch vs f32 reference"

    print("KERNEL_OK")
</pallas_src>

<mosaic_0001>
module attributes {stable_mosaic.version = 11 : i64} {
  func.func @dqn_mlp_kernel(%arg0: i32, %arg1: memref<256x32xbf16, #tpu.memory_space<vmem>>, %arg2: memref<32x128xbf16, #tpu.memory_space<vmem>>, %arg3: memref<1x128xf32, #tpu.memory_space<vmem>>, %arg4: memref<128x128xbf16, #tpu.memory_space<vmem>>, %arg5: memref<1x128xf32, #tpu.memory_space<vmem>>, %arg6: memref<128x128xbf16, #tpu.memory_space<vmem>>, %arg7: memref<1x128xf32, #tpu.memory_space<vmem>>, %arg8: memref<256x128xf32, #tpu.memory_space<vmem>>) attributes {dimension_semantics = [#tpu.dimension_semantics<parallel>], iteration_bounds = array<i64: 1>, scalar_prefetch = 0 : i64, scratch_operands = 0 : i64, tpu.core_type = #tpu.core_type<tc>, window_params = [{transform_indices = @transform_0, window_bounds = array<i64: 256, 32>}, {pipeline_mode = #tpu.pipeline_mode<synchronous>, transform_indices = @transform_1, window_bounds = array<i64: 32, 128>}, {pipeline_mode = #tpu.pipeline_mode<synchronous>, transform_indices = @transform_2, window_bounds = array<i64: 1, 128>}, {pipeline_mode = #tpu.pipeline_mode<synchronous>, transform_indices = @transform_3, window_bounds = array<i64: 128, 128>}, {pipeline_mode = #tpu.pipeline_mode<synchronous>, transform_indices = @transform_4, window_bounds = array<i64: 1, 128>}, {pipeline_mode = #tpu.pipeline_mode<synchronous>, transform_indices = @transform_5, window_bounds = array<i64: 128, 128>}, {pipeline_mode = #tpu.pipeline_mode<synchronous>, transform_indices = @transform_6, window_bounds = array<i64: 1, 128>}, {transform_indices = @transform_7, window_bounds = array<i64: 256, 128>}]} {
    %c0 = arith.constant 0 : index
    %c0_0 = arith.constant 0 : index
    %0 = vector.load %arg1[%c0, %c0_0] : memref<256x32xbf16, #tpu.memory_space<vmem>>, vector<256x32xbf16>
    %c0_1 = arith.constant 0 : index
    %c0_2 = arith.constant 0 : index
    %1 = vector.load %arg2[%c0_1, %c0_2] : memref<32x128xbf16, #tpu.memory_space<vmem>>, vector<32x128xbf16>
    %cst = arith.constant dense<0.000000e+00> : vector<256x128xf32>
    %2 = tpu.matmul %0, %1, %cst {dimension_numbers = #tpu.dot_dimension_numbers<[1], [0], [0], [1], [0, 0, 1, 1], [], []>} : vector<256x32xbf16>, vector<32x128xbf16>, vector<256x128xf32> -> vector<256x128xf32>
    %c0_3 = arith.constant 0 : index
    %c0_4 = arith.constant 0 : index
    %3 = vector.load %arg3[%c0_3, %c0_4] : memref<1x128xf32, #tpu.memory_space<vmem>>, vector<1x128xf32>
    %4 = vector.broadcast %3 : vector<1x128xf32> to vector<256x128xf32>
    %5 = arith.addf %2, %4 : vector<256x128xf32>
    %cst_5 = arith.constant 0.000000e+00 : f32
    %6 = vector.broadcast %cst_5 : f32 to vector<256x128xf32>
    %7 = arith.maximumf %5, %6 : vector<256x128xf32>
    %8 = arith.truncf %7 : vector<256x128xf32> to vector<256x128xbf16>
    %c0_6 = arith.constant 0 : index
    %c0_7 = arith.constant 0 : index
    %9 = vector.load %arg4[%c0_6, %c0_7] : memref<128x128xbf16, #tpu.memory_space<vmem>>, vector<128x128xbf16>
    %cst_8 = arith.constant dense<0.000000e+00> : vector<256x128xf32>
    %10 = tpu.matmul %8, %9, %cst_8 {dimension_numbers = #tpu.dot_dimension_numbers<[1], [0], [0], [1], [0, 0, 1, 1], [], []>} : vector<256x128xbf16>, vector<128x128xbf16>, vector<256x128xf32> -> vector<256x128xf32>
    %c0_9 = arith.constant 0 : index
    %c0_10 = arith.constant 0 : index
    %11 = vector.load %arg5[%c0_9, %c0_10] : memref<1x128xf32, #tpu.memory_space<vmem>>, vector<1x128xf32>
    %12 = vector.broadcast %11 : vector<1x128xf32> to vector<256x128xf32>
    %13 = arith.addf %10, %12 : vector<256x128xf32>
    %cst_11 = arith.constant 0.000000e+00 : f32
    %14 = vector.broadcast %cst_11 : f32 to vector<256x128xf32>
    %15 = arith.maximumf %13, %14 : vector<256x128xf32>
    %16 = arith.truncf %15 : vector<256x128xf32> to vector<256x128xbf16>
    %c0_12 = arith.constant 0 : index
    %c0_13 = arith.constant 0 : index
    %17 = vector.load %arg6[%c0_12, %c0_13] : memref<128x128xbf16, #tpu.memory_space<vmem>>, vector<128x128xbf16>
    %cst_14 = arith.constant dense<0.000000e+00> : vector<256x128xf32>
    %18 = tpu.matmul %16, %17, %cst_14 {dimension_numbers = #tpu.dot_dimension_numbers<[1], [0], [0], [1], [0, 0, 1, 1], [], []>} : vector<256x128xbf16>, vector<128x128xbf16>, vector<256x128xf32> -> vector<256x128xf32>
    %c0_15 = arith.constant 0 : index
    %c0_16 = arith.constant 0 : index
    %19 = vector.load %arg7[%c0_15, %c0_16] : memref<1x128xf32, #tpu.memory_space<vmem>>, vector<1x128xf32>
    %20 = vector.broadcast %19 : vector<1x128xf32> to vector<256x128xf32>
    %21 = arith.addf %18, %20 : vector<256x128xf32>
    %c0_17 = arith.constant 0 : index
    %c0_18 = arith.constant 0 : index
    %22 = vector.load %arg8[%c0_17, %c0_18] : memref<256x128xf32, #tpu.memory_space<vmem>>, vector<256x128xf32>
    tpu.vector_store %arg8[%c0_17, %c0_18], %21 {strides = array<i32>} : memref<256x128xf32, #tpu.memory_space<vmem>>, vector<256x128xf32>,
    return
  }
  func.func @transform_0(%arg0: i32) -> (i32, i32) {
    %c0_i32 = arith.constant 0 : i32
    %c0_i32_0 = arith.constant 0 : i32
    return %arg0, %c0_i32 : i32, i32
  }
  func.func @transform_1(%arg0: i32) -> (i32, i32) {
    %c0_i32 = arith.constant 0 : i32
    %c0_i32_0 = arith.constant 0 : i32
    %c0_i32_1 = arith.constant 0 : i32
    return %c0_i32, %c0_i32_0 : i32, i32
  }
  func.func @transform_2(%arg0: i32) -> (i32, i32) {
    %c0_i32 = arith.constant 0 : i32
    %c0_i32_0 = arith.constant 0 : i32
    %c0_i32_1 = arith.constant 0 : i32
    return %c0_i32, %c0_i32_0 : i32, i32
  }
  func.func @transform_3(%arg0: i32) -> (i32, i32) {
    %c0_i32 = arith.constant 0 : i32
    %c0_i32_0 = arith.constant 0 : i32
    %c0_i32_1 = arith.constant 0 : i32
    return %c0_i32, %c0_i32_0 : i32, i32
  }
  func.func @transform_4(%arg0: i32) -> (i32, i32) {
    %c0_i32 = arith.constant 0 : i32
    %c0_i32_0 = arith.constant 0 : i32
    %c0_i32_1 = arith.constant 0 : i32
    return %c0_i32, %c0_i32_0 : i32, i32
  }
  func.func @transform_5(%arg0: i32) -> (i32, i32) {
    %c0_i32 = arith.constant 0 : i32
    %c0_i32_0 = arith.constant 0 : i32
    %c0_i32_1 = arith.constant 0 : i32
    return %c0_i32, %c0_i32_0 : i32, i32
  }
  func.func @transform_6(%arg0: i32) -> (i32, i32) {
    %c0_i32 = arith.constant 0 : i32
    %c0_i32_0 = arith.constant 0 : i32
    %c0_i32_1 = arith.constant 0 : i32
    return %c0_i32, %c0_i32_0 : i32, i32
  }
  func.func @transform_7(%arg0: i32) -> (i32, i32) {
    %c0_i32 = arith.constant 0 : i32
    %c0_i32_0 = arith.constant 0 : i32
    return %arg0, %c0_i32 : i32, i32
  }
}

</mosaic_0001>

<bundles_post_ra>
// kernel: tpu_custom_call.1
= control target key start
LH: loop header
LB: loop body
LE: loop exit
PB: predicated region body
PF: predicated region fallthrough
CT: control target
= control target key end

     0   :  { %s1269_s0 = inlined_call_operand.vmem [shape: bf16[256,32], index: 0, kind: input, shape index: {}]   ;;  %s1270_s1 = inlined_call_operand.vmem [shape: bf16[32,128], index: 1, kind: input, shape index: {}]   ;;  %s1271_s2 = inlined_call_operand.vmem [shape: f32[1,128], index: 2, kind: input, shape index: {}]   ;;  %s1272_s3 = inlined_call_operand.vmem [shape: bf16[128,128], index: 3, kind: input, shape index: {}]   ;;  %s1273_s4 = inlined_call_operand.vmem [shape: f32[1,128], index: 4, kind: input, shape index: {}]   ;;  %s1274_s5 = inlined_call_operand.vmem [shape: bf16[128,128], index: 5, kind: input, shape index: {}]   ;;  %s1275_s6 = inlined_call_operand.vmem [shape: f32[1,128], index: 6, kind: input, shape index: {}]   ;;  %s1276_s7 = inlined_call_operand.hbm [shape: f32[256,128], index: 7, kind: output, shape index: {}]  }
   0x1   :  { %v927_v0 = vld [vmem:[%s1270_s1 + $0x8] sm:$0xff]  ;;  %v926_v1 = vld [vmem:[%s1270_s1] sm:$0xff] }
   0x2   :  { %215 = vmatpush.bf16.msra.mxu0 %v927_v0  ;;  %944 = vmatpush.bf16.msra.mxu3 %v927_v0 }
   0x3   :  { %12 = vsyncpa [#allocation3], 0  ;;  %v910_v2 = vld [vmem:[%s1269_s0] sm:$0xff]  ;;  %vm160_vm0 = vcmask 261120   ;;  %v911_v3 = vld [vmem:[%s1269_s0 + $0x8] sm:$0xff]  ;;  %s746_s22 = sshll.u32 %s1276_s7, 4  ;;  %s747_s22 = int_to_ptr.hbm [resolvable:$true] %s746_s22 }
   0x4   :  { %v912_v4 = vld [vmem:[%s1269_s0 + $0x10] sm:$0xff]  ;;  %v913_v5 = vld [vmem:[%s1269_s0 + $0x18] sm:$0xff]  ;;  %v914_v6 = vld [vmem:[%s1269_s0 + $0x20] sm:$0xff]  ;;  %s995_s23 = smov 128   ;;  %s996_s24 = smov 8  }
   0x5   :  { %v935_v7 = vld [vmem:[%s1272_s3 + $0x38] sm:$0xff]  ;;  %v915_v8 = vld [vmem:[%s1269_s0 + $0x28] sm:$0xff]  ;;  %v934_v9 = vld [vmem:[%s1272_s3 + $0x30] sm:$0xff] }
   0x6   :  { %216 = vmatpush.bf16.msra.mxu0 %v926_v1  ;;  %945 = vmatpush.bf16.msra.mxu3 %v926_v1  ;;  %v933_v10 = vld [vmem:[%s1272_s3 + $0x28] sm:$0xff]  ;;  %v932_v11 = vld [vmem:[%s1272_s3 + $0x20] sm:$0xff]  ;;  %v931_v12 = vld [vmem:[%s1272_s3 + $0x18] sm:$0xff] }
   0x7   :  { %414 = vmatpush.bf16.msra.mxu1 %v935_v7  ;;  %v916_v13 = vld [vmem:[%s1269_s0 + $0x30] sm:$0xff]  ;;  %v929_v15 = vld [vmem:[%s1272_s3 + $0x8] sm:$0xff]  ;;  %v928_v16 = vld [vmem:[%s1272_s3] sm:$0xff] }
   0x8   :  { %v930_v14 = vld [vmem:[%s1272_s3 + $0x10] sm:$0xff]  ;;  %v917_v17 = vld [vmem:[%s1269_s0 + $0x38] sm:$0xff]  ;;  %v918_v18 = vld [vmem:[%s1269_s0 + $0x40] sm:$0xff] }
   0x9   :  { %830 = vmatmul.msk.bf16.vlgmr.msra.gmra.mxu0 %vm160_vm0, %v910_v2  ;;  %v1105_v20 = vld [vmem:[%s1271_s2] ss:$0 sm:$0xff]  ;;  %v919_v27 = vld [vmem:[%s1269_s0 + $0x48] sm:$0xff]  ;;  %v920_v35 = vld [vmem:[%s1269_s0 + $0x50] sm:$0xff] }
   0xa   :  { %946 = vmatpush.bf16.msrb.mxu3 %v935_v7  ;;  %v923_v37 = vld [vmem:[%s1269_s0 + $0x68] sm:$0xff]  ;;  %v921_v44 = vld [vmem:[%s1269_s0 + $0x58] sm:$0xff]  ;;  %v924_v46 = vld [vmem:[%s1269_s0 + $0x70] sm:$0xff] }
   0xb   :  { %415 = vmatpush.bf16.msra.mxu1 %v934_v9  ;;  %843 = vmatmul.msk.bf16.vlgmr.msra.gmra.mxu3 %vm160_vm0, %v923_v37  ;;  %v922_v53 = vld [vmem:[%s1269_s0 + $0x60] sm:$0xff]  ;;  %v925_v55 = vld [vmem:[%s1269_s0 + $0x78] sm:$0xff] }
   0xc   :  { %v943_v2 = vld [vmem:[%s1274_s5 + $0x38] sm:$0xff] }
   0xd   :  { %619 = vmatpush.bf16.msra.mxu2 %v943_v2 }
   0xe   :  { %947 = vmatpush.bf16.msrb.mxu3 %v934_v9  ;;  %v940_v9 = vld [vmem:[%s1274_s5 + $0x20] sm:$0xff] }
   0xf   :  { %416 = vmatpush.bf16.msra.mxu1 %v933_v10 }
  0x12   :  { %948 = vmatpush.bf16.msrb.mxu3 %v933_v10 }
  0x13   :  { %417 = vmatpush.bf16.msra.mxu1 %v932_v11 }
  0x16   :  { %949 = vmatpush.bf16.msrb.mxu3 %v932_v11 }
  0x17   :  { %418 = vmatpush.bf16.msra.mxu1 %v931_v12 }
  0x19   :  { %831 = vmatmul.msk.bf16.gmra.mxu0 %vm160_vm0, %v911_v3 }
  0x1a   :  { %950 = vmatpush.bf16.msrb.mxu3 %v931_v12 }
  0x1b   :  { %419 = vmatpush.bf16.msra.mxu1 %v930_v14  ;;  %844 = vmatmul.msk.bf16.gmra.mxu3 %vm160_vm0, %v924_v46 }
  0x1e   :  { %951 = vmatpush.bf16.msrb.mxu3 %v930_v14 }
  0x1f   :  { %420 = vmatpush.bf16.msra.mxu1 %v929_v15 }
  0x22   :  { %952 = vmatpush.bf16.msrb.mxu3 %v929_v15 }
  0x23   :  { %421 = vmatpush.bf16.msra.mxu1 %v928_v16 }
  0x26   :  { %953 = vmatpush.bf16.msrb.mxu3 %v928_v16 }
  0x29   :  { %832 = vmatmul.msk.bf16.gmra.mxu0 %vm160_vm0, %v912_v4 }
  0x2a   :  { %954 = vmatpush.bf16.msra.mxu3 %v943_v2 }
  0x2b   :  { %845 = vmatmul.msk.bf16.gmra.mxu3 %vm160_vm0, %v925_v55 }
  0x39   :  { %833 = vmatmul.msk.bf16.gmra.mxu0 %vm160_vm0, %v913_v5 }
  0x49   :  { %834 = vmatmul.msk.bf16.gmra.mxu0 %vm160_vm0, %v914_v6  ;;  %v942_v6 = vld [vmem:[%s1274_s5 + $0x30] sm:$0xff] }
  0x4a   :  { %620 = vmatpush.bf16.msra.mxu2 %v942_v6  ;;  %955 = vmatpush.bf16.msra.mxu3 %v942_v6 }
  0x59   :  { %835 = vmatmul.msk.bf16.gmra.mxu0 %vm160_vm0, %v915_v8  ;;  %v941_v8 = vld [vmem:[%s1274_s5 + $0x28] sm:$0xff] }
  0x5a   :  { %621 = vmatpush.bf16.msra.mxu2 %v941_v8  ;;  %956 = vmatpush.bf16.msra.mxu3 %v941_v8 }
  0x5e   :  { %622 = vmatpush.bf16.msra.mxu2 %v940_v9  ;;  %957 = vmatpush.bf16.msra.mxu3 %v940_v9 }
  0x69   :  { %836 = vmatmul.msk.bf16.gmra.mxu0 %vm160_vm0, %v916_v13  ;;  %v939_v13 = vld [vmem:[%s1274_s5 + $0x18] sm:$0xff] }
  0x6a   :  { %623 = vmatpush.bf16.msra.mxu2 %v939_v13  ;;  %958 = vmatpush.bf16.msra.mxu3 %v939_v13 }
  0x79   :  { %837 = vmatmul.msk.bf16.gmra.mxu0 %vm160_vm0, %v917_v17  ;;  %v938_v17 = vld [vmem:[%s1274_s5 + $0x10] sm:$0xff] }
  0x7a   :  { %624 = vmatpush.bf16.msra.mxu2 %v938_v17  ;;  %959 = vmatpush.bf16.msra.mxu3 %v938_v17 }
  0x86   :  { %v218_v19 = vpop.f32.mrf.mxu0 }
  0x87   :  { %v219_v21 = vadd.f32 %v1105_v20, %v218_v19  ;;  %v937_v19 = vld [vmem:[%s1274_s5 + $0x8] sm:$0xff] }
  0x88   :  { %625 = vmatpush.bf16.msra.mxu2 %v937_v19  ;;  %960 = vmatpush.bf16.msra.mxu3 %v937_v19 }
  0x89   :  { %838 = vmatmul.msk.bf16.gmra.mxu0 %vm160_vm0, %v918_v18  ;;  %v298_v24 = vmax.f32 %v219_v21, 0.0  ;;  %v936_v21 = vld [vmem:[%s1274_s5] sm:$0xff] }
  0x8c   :  { %626 = vmatpush.bf16.msra.mxu2 %v936_v21  ;;  %961 = vmatpush.bf16.msra.mxu3 %v936_v21 }
  0x8e   :  { %v220_v22 = vpop.f32.mrf.mxu0 }
  0x8f   :  { %v221_v23 = vadd.f32 %v1105_v20, %v220_v22 }
  0x91   :  { %v299_v25 = vmax.f32 %v221_v23, 0.0 }
  0x93   :  { %v330_v26 = vpack.c.bf16 %v299_v25, %v298_v24 }
  0x95   :  { %422 = vmatmul.bf16.vlgmr.msra.gmra.mxu1 %v330_v26 }
  0x96   :  { %v223_v28 = vpop.f32.mrf.mxu0 }
  0x97   :  { %v224_v29 = vadd.f32 %v1105_v20, %v223_v28 }
  0x99   :  { %839 = vmatmul.msk.bf16.gmra.mxu0 %vm160_vm0, %v919_v27  ;;  %v300_v32 = vmax.f32 %v224_v29, 0.0 }
  0x9e   :  { %v225_v30 = vpop.f32.mrf.mxu0 }
  0x9f   :  { %v226_v31 = vadd.f32 %v1105_v20, %v225_v30 }
  0xa1   :  { %v301_v33 = vmax.f32 %v226_v31, 0.0 }
  0xa3   :  { %v331_v34 = vpack.c.bf16 %v301_v33, %v300_v32 }
  0xa5   :  { %427 = vmatmul.bf16.gmra.mxu1 %v331_v34 }
  0xa6   :  { %v228_v36 = vpop.f32.mrf.mxu0 }
  0xa7   :  { %v229_v38 = vadd.f32 %v1105_v20, %v228_v36  ;;  %v1181_v36 = vld [vmem:[%s1273_s4] ss:$0 sm:$0xff] }
  0xa9   :  { %840 = vmatmul.msk.bf16.gmra.mxu0 %vm160_vm0, %v920_v35  ;;  %v302_v41 = vmax.f32 %v229_v38, 0.0 }
  0xae   :  { %v230_v39 = vpop.f32.mrf.mxu0 }
  0xaf   :  { %v231_v40 = vadd.f32 %v1105_v20, %v230_v39 }
  0xb1   :  { %v303_v42 = vmax.f32 %v231_v40, 0.0 }
  0xb3   :  { %v332_v43 = vpack.c.bf16 %v303_v42, %v302_v41 }
  0xb5   :  { %432 = vmatmul.bf16.gmra.mxu1 %v332_v43 }
  0xb6   :  { %v233_v45 = vpop.f32.mrf.mxu0 }
  0xb7   :  { %v234_v47 = vadd.f32 %v1105_v20, %v233_v45 }
  0xb9   :  { %841 = vmatmul.msk.bf16.gmra.mxu0 %vm160_vm0, %v921_v44  ;;  %v304_v50 = vmax.f32 %v234_v47, 0.0 }
  0xbe   :  { %v235_v48 = vpop.f32.mrf.mxu0 }
  0xbf   :  { %v236_v49 = vadd.f32 %v1105_v20, %v235_v48 }
  0xc1   :  { %v305_v51 = vmax.f32 %v236_v49, 0.0 }
  0xc3   :  { %v333_v52 = vpack.c.bf16 %v305_v51, %v304_v50 }
  0xc5   :  { %437 = vmatmul.bf16.gmra.mxu1 %v333_v52 }
  0xc6   :  { %v238_v54 = vpop.f32.mrf.mxu0 }
  0xc7   :  { %v239_v56 = vadd.f32 %v1105_v20, %v238_v54 }
  0xc9   :  { %842 = vmatmul.msk.bf16.gmra.mxu0 %vm160_vm0, %v922_v53  ;;  %v306_v59 = vmax.f32 %v239_v56, 0.0 }
  0xce   :  { %v240_v57 = vpop.f32.mrf.mxu0 }
  0xcf   :  { %v241_v58 = vadd.f32 %v1105_v20, %v240_v57 }
  0xd1   :  { %v307_v60 = vmax.f32 %v241_v58, 0.0 }
  0xd3   :  { %v334_v61 = vpack.c.bf16 %v307_v60, %v306_v59 }
  0xd5   :  { %442 = vmatmul.bf16.gmra.mxu1 %v334_v61 }
  0xd6   :  { %v243_v62 = vpop.f32.mrf.mxu0 }
  0xd7   :  { %v244_v63 = vadd.f32 %v1105_v20, %v243_v62 }
  0xd9   :  { %v308_v3 = vmax.f32 %v244_v63, 0.0 }
  0xde   :  { %v245_v0 = vpop.f32.mrf.mxu0 }
  0xdf   :  { %v246_v1 = vadd.f32 %v1105_v20, %v245_v0 }
  0xe1   :  { %v309_v4 = vmax.f32 %v246_v1, 0.0 }
  0xe3   :  { %v335_v5 = vpack.c.bf16 %v309_v4, %v308_v3 }
  0xe5   :  { %447 = vmatmul.bf16.gmra.mxu1 %v335_v5 }
  0xe6   :  { %v248_v7 = vpop.f32.mrf.mxu0 }
  0xe7   :  { %v249_v10 = vadd.f32 %v1105_v20, %v248_v7 }
  0xe9   :  { %v310_v14 = vmax.f32 %v249_v10, 0.0 }
  0xee   :  { %v250_v11 = vpop.f32.mrf.mxu0 }
  0xef   :  { %v251_v12 = vadd.f32 %v1105_v20, %v250_v11 }
  0xf1   :  { %v311_v15 = vmax.f32 %v251_v12, 0.0 }
  0xf3   :  { %v336_v16 = vpack.c.bf16 %v311_v15, %v310_v14 }
  0xf5   :  { %452 = vmatmul.bf16.gmra.mxu1 %v336_v16  ;;  %v283_v16 = vpop.f32.mrf.mxu3 }
  0xf6   :  { %v253_v18 = vpop.f32.mrf.mxu0 }
  0xf7   :  { %v254_v22 = vadd.f32 %v1105_v20, %v253_v18 }
  0xf9   :  { %v312_v25 = vmax.f32 %v254_v22, 0.0 }
  0xfe   :  { %v255_v23 = vpop.f32.mrf.mxu0 }
  0xff   :  { %v256_v24 = vadd.f32 %v1105_v20, %v255_v23 }
 0x101   :  { %v313_v26 = vmax.f32 %v256_v24, 0.0 }
 0x103   :  { %v337_v27 = vpack.c.bf16 %v313_v26, %v312_v25 }
 0x105   :  { %457 = vmatmul.bf16.gmra.mxu1 %v337_v27  ;;  %v285_v27 = vpop.f32.mrf.mxu3 }
 0x106   :  { %v258_v28 = vpop.f32.mrf.mxu0 }
 0x107   :  { %v259_v29 = vadd.f32 %v1105_v20, %v258_v28 }
 0x109   :  { %v314_v32 = vmax.f32 %v259_v29, 0.0 }
 0x10e   :  { %v260_v30 = vpop.f32.mrf.mxu0 }
 0x10f   :  { %v261_v31 = vadd.f32 %v1105_v20, %v260_v30 }
 0x111   :  { %v315_v33 = vmax.f32 %v261_v31, 0.0 }
 0x112   :  { %v423_v34 = vpop.f32.mrf.mxu1 }
 0x113   :  { %v338_v35 = vpack.c.bf16 %v315_v33, %v314_v32  ;;  %v424_v38 = vadd.f32 %v1181_v36, %v423_v34  ;;  %v288_v34 = vpop.f32.mrf.mxu3 }
 0x115   :  { %462 = vmatmul.bf16.gmra.mxu1 %v338_v35  ;;  %v503_v41 = vmax.f32 %v424_v38, 0.0  ;;  %v284_v35 = vadd.f32 %v1105_v20, %v283_v16 }
 0x116   :  { %v263_v37 = vpop.f32.mrf.mxu0 }
 0x117   :  { %v264_v42 = vadd.f32 %v1105_v20, %v263_v37  ;;  %v286_v37 = vadd.f32 %v1105_v20, %v285_v27 }
 0x119   :  { %v316_v47 = vmax.f32 %v264_v42, 0.0  ;;  %v325_v42 = vmax.f32 %v286_v37, 0.0 }
 0x11a   :  { %v425_v39 = vpop.f32.mrf.mxu1 }
 0x11b   :  { %v426_v40 = vadd.f32 %v1181_v36, %v425_v39 }
 0x11d   :  { %v504_v43 = vmax.f32 %v426_v40, 0.0 }
 0x11e   :  { %v265_v44 = vpop.f32.mrf.mxu0 }
 0x11f   :  { %v266_v45 = vadd.f32 %v1105_v20, %v265_v44  ;;  %v535_v46 = vpack.c.bf16 %v504_v43, %v503_v41  ;;  %v324_v41 = vmax.f32 %v284_v35, 0.0 }
 0x121   :  { %v317_v48 = vmax.f32 %v266_v45, 0.0  ;;  %627 = vmatmul.bf16.vlgmr.msra.gmra.mxu2 %v535_v46  ;;  %v343_v45 = vpack.c.bf16 %v325_v42, %v324_v41  ;;  %v290_v46 = vpop.f32.mrf.mxu3 }
 0x122   :  { %v428_v49 = vpop.f32.mrf.mxu1 }
 0x123   :  { %v339_v50 = vpack.c.bf16 %v317_v48, %v316_v47  ;;  %v429_v52 = vadd.f32 %v1181_v36, %v428_v49  ;;  %v289_v49 = vadd.f32 %v1105_v20, %v288_v34 }
 0x125   :  { %467 = vmatmul.bf16.gmra.mxu1 %v339_v50  ;;  %v505_v55 = vmax.f32 %v429_v52, 0.0  ;;  %v291_v50 = vadd.f32 %v1105_v20, %v290_v46 }
 0x126   :  { %v268_v51 = vpop.f32.mrf.mxu0 }
 0x127   :  { %v269_v56 = vadd.f32 %v1105_v20, %v268_v51 }
 0x129   :  { %v318_v61 = vmax.f32 %v269_v56, 0.0  ;;  %v327_v56 = vmax.f32 %v291_v50, 0.0 }
 0x12a   :  { %v430_v53 = vpop.f32.mrf.mxu1 }
 0x12b   :  { %v431_v54 = vadd.f32 %v1181_v36, %v430_v53 }
 0x12d   :  { %v506_v57 = vmax.f32 %v431_v54, 0.0  ;;  %v293_v54 = vpop.f32.mrf.mxu3 }
 0x12e   :  { %v270_v58 = vpop.f32.mrf.mxu0 }
 0x12f   :  { %v271_v59 = vadd.f32 %v1105_v20, %v270_v58  ;;  %v536_v60 = vpack.c.bf16 %v506_v57, %v505_v55  ;;  %v326_v55 = vmax.f32 %v289_v49, 0.0 }
 0x131   :  { %v319_v62 = vmax.f32 %v271_v59, 0.0  ;;  %632 = vmatmul.bf16.gmra.mxu2 %v536_v60  ;;  %v344_v59 = vpack.c.bf16 %v327_v56, %v326_v55 }
 0x132   :  { %v433_v63 = vpop.f32.mrf.mxu1 }
 0x133   :  { %v340_v0 = vpack.c.bf16 %v319_v62, %v318_v61  ;;  %v434_v2 = vadd.f32 %v1181_v36, %v433_v63  ;;  %v294_v63 = vadd.f32 %v1105_v20, %v293_v54 }
 0x135   :  { %472 = vmatmul.bf16.gmra.mxu1 %v340_v0  ;;  %v507_v5 = vmax.f32 %v434_v2, 0.0  ;;  %v295_v60 = vpop.f32.mrf.mxu3 }
 0x136   :  { %v273_v1 = vpop.f32.mrf.mxu0  ;;  %v296_v0 = vadd.f32 %v1105_v20, %v295_v60 }
 0x137   :  { %v274_v6 = vadd.f32 %v1105_v20, %v273_v1 }
 0x139   :  { %v320_v11 = vmax.f32 %v274_v6, 0.0 }
 0x13a   :  { %v435_v3 = vpop.f32.mrf.mxu1 }
 0x13b   :  { %v436_v4 = vadd.f32 %v1181_v36, %v435_v3 }
 0x13d   :  { %v508_v7 = vmax.f32 %v436_v4, 0.0  ;;  %v328_v4 = vmax.f32 %v294_v63, 0.0 }
 0x13e   :  { %v275_v8 = vpop.f32.mrf.mxu0 }
 0x13f   :  { %v276_v9 = vadd.f32 %v1105_v20, %v275_v8  ;;  %v537_v10 = vpack.c.bf16 %v508_v7, %v507_v5  ;;  %v329_v5 = vmax.f32 %v296_v0, 0.0 }
 0x141   :  { %v321_v12 = vmax.f32 %v276_v9, 0.0  ;;  %637 = vmatmul.bf16.gmra.mxu2 %v537_v10  ;;  %v345_v8 = vpack.c.bf16 %v329_v5, %v328_v4 }
 0x142   :  { %v438_v13 = vpop.f32.mrf.mxu1 }
 0x143   :  { %v341_v14 = vpack.c.bf16 %v321_v12, %v320_v11  ;;  %v439_v17 = vadd.f32 %v1181_v36, %v438_v13 }
 0x145   :  { %477 = vmatmul.bf16.gmra.mxu1 %v341_v14  ;;  %v509_v21 = vmax.f32 %v439_v17, 0.0 }
 0x146   :  { %v278_v15 = vpop.f32.mrf.mxu0 }
 0x147   :  { %v279_v22 = vadd.f32 %v1105_v20, %v278_v15 }
 0x149   :  { %v322_v28 = vmax.f32 %v279_v22, 0.0  ;;  %v1218_v22 = vld [vmem:[%s1275_s6] ss:$0 sm:$0xff]  ;;  %s994_s6 = smov [#allocation2]  }
 0x14a   :  { %v440_v18 = vpop.f32.mrf.mxu1  ;;  %s744_s19 = sshll.u32 %s994_s6, 4  ;;  %s745_s19 = int_to_ptr.vmem [resolvable:$true] %s744_s19 }
 0x14b   :  { %v441_v19 = vadd.f32 %v1181_v36, %v440_v18 }
 0x14d   :  { %v510_v23 = vmax.f32 %v441_v19, 0.0 }
 0x14e   :  { %v280_v24 = vpop.f32.mrf.mxu0 }
 0x14f   :  { %v281_v25 = vadd.f32 %v1105_v20, %v280_v24  ;;  %v538_v26 = vpack.c.bf16 %v510_v23, %v509_v21 }
 0x151   :  { %v323_v29 = vmax.f32 %v281_v25, 0.0  ;;  %642 = vmatmul.bf16.gmra.mxu2 %v538_v26 }
 0x152   :  { %v443_v30 = vpop.f32.mrf.mxu1 }
 0x153   :  { %v342_v31 = vpack.c.bf16 %v323_v29, %v322_v28  ;;  %v444_v32 = vadd.f32 %v1181_v36, %v443_v30 }
 0x155   :  { %482 = vmatmul.bf16.vlgmr.msrb.gmra.mxu3 %v342_v31  ;;  %v511_v39 = vmax.f32 %v444_v32, 0.0 }
 0x15a   :  { %v445_v33 = vpop.f32.mrf.mxu1 }
 0x15b   :  { %v446_v38 = vadd.f32 %v1181_v36, %v445_v33 }
 0x15d   :  { %v512_v40 = vmax.f32 %v446_v38, 0.0 }
 0x15f   :  { %v539_v43 = vpack.c.bf16 %v512_v40, %v511_v39 }
 0x161   :  { %647 = vmatmul.bf16.gmra.mxu2 %v539_v43 }
 0x162   :  { %v448_v44 = vpop.f32.mrf.mxu1 }
 0x163   :  { %v449_v47 = vadd.f32 %v1181_v36, %v448_v44 }
 0x165   :  { %487 = vmatmul.bf16.gmra.mxu3 %v343_v45  ;;  %v513_v52 = vmax.f32 %v449_v47, 0.0 }
 0x16a   :  { %v450_v48 = vpop.f32.mrf.mxu1 }
 0x16b   :  { %v451_v51 = vadd.f32 %v1181_v36, %v450_v48 }
 0x16d   :  { %v514_v53 = vmax.f32 %v451_v51, 0.0 }
 0x16f   :  { %v540_v57 = vpack.c.bf16 %v514_v53, %v513_v52 }
 0x171   :  { %652 = vmatmul.bf16.gmra.mxu2 %v540_v57 }
 0x172   :  { %v453_v58 = vpop.f32.mrf.mxu1 }
 0x173   :  { %v454_v61 = vadd.f32 %v1181_v36, %v453_v58 }
 0x175   :  { %492 = vmatmul.bf16.gmra.mxu3 %v344_v59  ;;  %v515_v2 = vmax.f32 %v454_v61, 0.0 }
 0x17a   :  { %v455_v62 = vpop.f32.mrf.mxu1 }
 0x17b   :  { %v456_v1 = vadd.f32 %v1181_v36, %v455_v62 }
 0x17d   :  { %v516_v3 = vmax.f32 %v456_v1, 0.0 }
 0x17f   :  { %v541_v6 = vpack.c.bf16 %v516_v3, %v515_v2 }
 0x181   :  { %657 = vmatmul.bf16.gmra.mxu2 %v541_v6 }
 0x182   :  { %v458_v7 = vpop.f32.mrf.mxu1 }
 0x183   :  { %v459_v9 = vadd.f32 %v1181_v36, %v458_v7 }
 0x185   :  { %497 = vmatmul.bf16.gmra.mxu3 %v345_v8  ;;  %v517_v12 = vmax.f32 %v459_v9, 0.0 }
 0x18a   :  { %v460_v10 = vpop.f32.mrf.mxu1 }
 0x18b   :  { %v461_v11 = vadd.f32 %v1181_v36, %v460_v10 }
 0x18d   :  { %v518_v13 = vmax.f32 %v461_v11, 0.0 }
 0x18f   :  { %v542_v14 = vpack.c.bf16 %v518_v13, %v517_v12 }
 0x191   :  { %662 = vmatmul.bf16.gmra.mxu2 %v542_v14 }
 0x192   :  { %v463_v20 = vpop.f32.mrf.mxu1 }
 0x193   :  { %v464_v15 = vadd.f32 %v1181_v36, %v463_v20 }
 0x195   :  { %v519_v18 = vmax.f32 %v464_v15, 0.0 }
 0x19a   :  { %v465_v16 = vpop.f32.mrf.mxu1 }
 0x19b   :  { %v466_v17 = vadd.f32 %v1181_v36, %v465_v16 }
 0x19d   :  { %v520_v19 = vmax.f32 %v466_v17, 0.0 }
 0x19f   :  { %v543_v21 = vpack.c.bf16 %v520_v19, %v519_v18 }
 0x1a1   :  { %667 = vmatmul.bf16.gmra.mxu2 %v543_v21 }
 0x1a2   :  { %v468_v23 = vpop.f32.mrf.mxu1 }
 0x1a3   :  { %v469_v26 = vadd.f32 %v1181_v36, %v468_v23 }
 0x1a4   :  { %v628_v24 = vpop.f32.mrf.mxu2 }
 0x1a5   :  { %v629_v25 = vadd.f32 %v1218_v22, %v628_v24  ;;  %v521_v30 = vmax.f32 %v469_v26, 0.0 }
 0x1a7   :  { %708 = vst [vmem:[#allocation2] sm:$0xff] %v629_v25 }
 0x1aa   :  { %v470_v27 = vpop.f32.mrf.mxu1 }
 0x1ab   :  { %v471_v28 = vadd.f32 %v1181_v36, %v470_v27 }
 0x1ac   :  { %v630_v29 = vpop.f32.mrf.mxu2 }
 0x1ad   :  { %v522_v31 = vmax.f32 %v471_v28, 0.0  ;;  %v631_v32 = vadd.f32 %v1218_v22, %v630_v29 }
 0x1af   :  { %709 = vst [vmem:[#allocation2 + $0x8] sm:$0xff] %v631_v32  ;;  %v544_v33 = vpack.c.bf16 %v522_v31, %v521_v30 }
 0x1b1   :  { %672 = vmatmul.bf16.gmra.mxu2 %v544_v33 }
 0x1b2   :  { %v473_v34 = vpop.f32.mrf.mxu1 }
 0x1b3   :  { %v474_v38 = vadd.f32 %v1181_v36, %v473_v34 }
 0x1b4   :  { %v633_v35 = vpop.f32.mrf.mxu2 }
 0x1b5   :  { %v634_v37 = vadd.f32 %v1218_v22, %v633_v35  ;;  %v523_v42 = vmax.f32 %v474_v38, 0.0 }
 0x1b7   :  { %710 = vst [vmem:[#allocation2 + $0x10] sm:$0xff] %v634_v37 }
 0x1ba   :  { %v475_v39 = vpop.f32.mrf.mxu1 }
 0x1bb   :  { %v476_v40 = vadd.f32 %v1181_v36, %v475_v39 }
 0x1bc   :  { %v635_v41 = vpop.f32.mrf.mxu2 }
 0x1bd   :  { %v524_v43 = vmax.f32 %v476_v40, 0.0  ;;  %v636_v44 = vadd.f32 %v1218_v22, %v635_v41 }
 0x1bf   :  { %711 = vst [vmem:[#allocation2 + $0x18] sm:$0xff] %v636_v44  ;;  %v545_v45 = vpack.c.bf16 %v524_v43, %v523_v42 }
 0x1c1   :  { %677 = vmatmul.bf16.gmra.mxu2 %v545_v45 }
 0x1c2   :  { %v478_v46 = vpop.f32.mrf.mxu1 }
 0x1c3   :  { %v479_v49 = vadd.f32 %v1181_v36, %v478_v46 }
 0x1c4   :  { %v638_v47 = vpop.f32.mrf.mxu2 }
 0x1c5   :  { %v639_v48 = vadd.f32 %v1218_v22, %v638_v47  ;;  %v525_v53 = vmax.f32 %v479_v49, 0.0 }
 0x1c7   :  { %712 = vst [vmem:[#allocation2 + $0x20] sm:$0xff] %v639_v48 }
 0x1ca   :  { %v480_v50 = vpop.f32.mrf.mxu1 }
 0x1cb   :  { %v481_v51 = vadd.f32 %v1181_v36, %v480_v50 }
 0x1cc   :  { %v640_v52 = vpop.f32.mrf.mxu2 }
 0x1cd   :  { %v526_v54 = vmax.f32 %v481_v51, 0.0  ;;  %v641_v55 = vadd.f32 %v1218_v22, %v640_v52 }
 0x1cf   :  { %713 = vst [vmem:[#allocation2 + $0x28] sm:$0xff] %v641_v55  ;;  %v546_v56 = vpack.c.bf16 %v526_v54, %v525_v53 }
 0x1d1   :  { %682 = vmatmul.bf16.gmra.mxu2 %v546_v56 }
 0x1d4   :  { %v643_v57 = vpop.f32.mrf.mxu2 }
 0x1d5   :  { %v644_v58 = vadd.f32 %v1218_v22, %v643_v57 }
 0x1d7   :  { %714 = vst [vmem:[#allocation2 + $0x30] sm:$0xff] %v644_v58 }
 0x1d8   :  { %v483_v59 = vpop.f32.mrf.mxu3 }
 0x1d9   :  { %v484_v62 = vadd.f32 %v1181_v36, %v483_v59 }
 0x1db   :  { %v527_v1 = vmax.f32 %v484_v62, 0.0 }
 0x1dc   :  { %v645_v60 = vpop.f32.mrf.mxu2 }
 0x1dd   :  { %v646_v61 = vadd.f32 %v1218_v22, %v645_v60 }
 0x1df   :  { %715 = vst [vmem:[#allocation2 + $0x38] sm:$0xff] %v646_v61 }
 0x1e0   :  { %v485_v63 = vpop.f32.mrf.mxu3 }
 0x1e1   :  { %v486_v0 = vadd.f32 %v1181_v36, %v485_v63 }
 0x1e3   :  { %v528_v2 = vmax.f32 %v486_v0, 0.0 }
 0x1e4   :  { %v648_v3 = vpop.f32.mrf.mxu2 }
 0x1e5   :  { %v547_v4 = vpack.c.bf16 %v528_v2, %v527_v1  ;;  %v649_v5 = vadd.f32 %v1218_v22, %v648_v3 }
 0x1e7   :  { %716 = vst [vmem:[#allocation2 + $0x40] sm:$0xff] %v649_v5  ;;  %687 = vmatmul.bf16.vlgmr.msra.gmra.mxu3 %v547_v4 }
 0x1e8   :  { %v488_v6 = vpop.f32.mrf.mxu3 }
 0x1e9   :  { %v489_v9 = vadd.f32 %v1181_v36, %v488_v6 }
 0x1eb   :  { %v529_v12 = vmax.f32 %v489_v9, 0.0 }
 0x1ec   :  { %v650_v7 = vpop.f32.mrf.mxu2 }
 0x1ed   :  { %v651_v8 = vadd.f32 %v1218_v22, %v650_v7 }
 0x1ef   :  { %717 = vst [vmem:[#allocation2 + $0x48] sm:$0xff] %v651_v8 }
 0x1f0   :  { %v490_v10 = vpop.f32.mrf.mxu3 }
 0x1f1   :  { %v491_v11 = vadd.f32 %v1181_v36, %v490_v10 }
 0x1f3   :  { %v530_v13 = vmax.f32 %v491_v11, 0.0 }
 0x1f4   :  { %v653_v14 = vpop.f32.mrf.mxu2 }
 0x1f5   :  { %v654_v20 = vadd.f32 %v1218_v22, %v653_v14  ;;  %v548_v15 = vpack.c.bf16 %v530_v13, %v529_v12 }
 0x1f7   :  { %718 = vst [vmem:[#allocation2 + $0x50] sm:$0xff] %v654_v20  ;;  %692 = vmatmul.bf16.gmra.mxu3 %v548_v15 }
 0x1f8   :  { %v493_v16 = vpop.f32.mrf.mxu3 }
 0x1f9   :  { %v494_v19 = vadd.f32 %v1181_v36, %v493_v16 }
 0x1fb   :  { %v531_v24 = vmax.f32 %v494_v19, 0.0 }
 0x1fc   :  { %v655_v17 = vpop.f32.mrf.mxu2 }
 0x1fd   :  { %v656_v18 = vadd.f32 %v1218_v22, %v655_v17 }
 0x1ff   :  { %719 = vst [vmem:[#allocation2 + $0x58] sm:$0xff] %v656_v18 }
 0x200   :  { %v495_v21 = vpop.f32.mrf.mxu3 }
 0x201   :  { %v496_v23 = vadd.f32 %v1181_v36, %v495_v21 }
 0x203   :  { %v532_v25 = vmax.f32 %v496_v23, 0.0 }
 0x204   :  { %v658_v26 = vpop.f32.mrf.mxu2 }
 0x205   :  { %v659_v27 = vadd.f32 %v1218_v22, %v658_v26  ;;  %v549_v28 = vpack.c.bf16 %v532_v25, %v531_v24 }
 0x207   :  { %720 = vst [vmem:[#allocation2 + $0x60] sm:$0xff] %v659_v27  ;;  %697 = vmatmul.bf16.gmra.mxu3 %v549_v28 }
 0x208   :  { %v498_v29 = vpop.f32.mrf.mxu3 }
 0x209   :  { %v499_v32 = vadd.f32 %v1181_v36, %v498_v29 }
 0x20b   :  { %v533_v35 = vmax.f32 %v499_v32, 0.0 }
 0x20c   :  { %v660_v30 = vpop.f32.mrf.mxu2 }
 0x20d   :  { %v661_v31 = vadd.f32 %v1218_v22, %v660_v30 }
 0x20f   :  { %721 = vst [vmem:[#allocation2 + $0x68] sm:$0xff] %v661_v31 }
 0x210   :  { %v500_v33 = vpop.f32.mrf.mxu3 }
 0x211   :  { %v501_v34 = vadd.f32 %v1181_v36, %v500_v33 }
 0x213   :  { %v534_v37 = vmax.f32 %v501_v34, 0.0 }
 0x214   :  { %v663_v38 = vpop.f32.mrf.mxu2 }
 0x215   :  { %v664_v39 = vadd.f32 %v1218_v22, %v663_v38  ;;  %v550_v40 = vpack.c.bf16 %v534_v37, %v533_v35 }
 0x217   :  { %722 = vst [vmem:[#allocation2 + $0x70] sm:$0xff] %v664_v39  ;;  %702 = vmatmul.bf16.gmra.mxu3 %v550_v40 }
 0x21c   :  { %v665_v41 = vpop.f32.mrf.mxu2 }
 0x21d   :  { %v666_v42 = vadd.f32 %v1218_v22, %v665_v41 }
 0x21f   :  { %723 = vst [vmem:[#allocation2 + $0x78] sm:$0xff] %v666_v42 }
 0x224   :  { %v668_v43 = vpop.f32.mrf.mxu2 }
 0x225   :  { %v669_v44 = vadd.f32 %v1218_v22, %v668_v43 }
 0x227   :  { %724 = vst [vmem:[#allocation2 + $0x80] sm:$0xff] %v669_v44 }
 0x22c   :  { %v670_v45 = vpop.f32.mrf.mxu2 }
 0x22d   :  { %v671_v46 = vadd.f32 %v1218_v22, %v670_v45 }
 0x22f   :  { %725 = vst [vmem:[#allocation2 + $0x88] sm:$0xff] %v671_v46 }
 0x234   :  { %v673_v36 = vpop.f32.mrf.mxu2 }
 0x235   :  { %v674_v47 = vadd.f32 %v1218_v22, %v673_v36 }
 0x237   :  { %726 = vst [vmem:[#allocation2 + $0x90] sm:$0xff] %v674_v47 }
 0x23c   :  { %v675_v48 = vpop.f32.mrf.mxu2 }
 0x23d   :  { %v676_v49 = vadd.f32 %v1218_v22, %v675_v48 }
 0x23f   :  { %727 = vst [vmem:[#allocation2 + $0x98] sm:$0xff] %v676_v49 }
 0x244   :  { %v678_v50 = vpop.f32.mrf.mxu2 }
 0x245   :  { %v679_v51 = vadd.f32 %v1218_v22, %v678_v50 }
 0x247   :  { %728 = vst [vmem:[#allocation2 + $0xa0] sm:$0xff] %v679_v51 }
 0x24c   :  { %v680_v52 = vpop.f32.mrf.mxu2 }
 0x24d   :  { %v681_v53 = vadd.f32 %v1218_v22, %v680_v52 }
 0x24f   :  { %729 = vst [vmem:[#allocation2 + $0xa8] sm:$0xff] %v681_v53 }
 0x254   :  { %v683_v54 = vpop.f32.mrf.mxu2 }
 0x255   :  { %v684_v55 = vadd.f32 %v1218_v22, %v683_v54 }
 0x257   :  { %730 = vst [vmem:[#allocation2 + $0xb0] sm:$0xff] %v684_v55 }
 0x25c   :  { %v685_v56 = vpop.f32.mrf.mxu2 }
 0x25d   :  { %v686_v57 = vadd.f32 %v1218_v22, %v685_v56 }
 0x25f   :  { %731 = vst [vmem:[#allocation2 + $0xb8] sm:$0xff] %v686_v57 }
 0x26a   :  { %v688_v58 = vpop.f32.mrf.mxu3 }
 0x26b   :  { %v689_v59 = vadd.f32 %v1218_v22, %v688_v58 }
 0x26d   :  { %732 = vst [vmem:[#allocation2 + $0xc0] sm:$0xff] %v689_v59 }
 0x272   :  { %v690_v60 = vpop.f32.mrf.mxu3 }
 0x273   :  { %v691_v61 = vadd.f32 %v1218_v22, %v690_v60 }
 0x275   :  { %733 = vst [vmem:[#allocation2 + $0xc8] sm:$0xff] %v691_v61 }
 0x27a   :  { %v693_v62 = vpop.f32.mrf.mxu3 }
 0x27b   :  { %v694_v63 = vadd.f32 %v1218_v22, %v693_v62 }
 0x27d   :  { %734 = vst [vmem:[#allocation2 + $0xd0] sm:$0xff] %v694_v63 }
 0x282   :  { %v695_v0 = vpop.f32.mrf.mxu3 }
 0x283   :  { %v696_v1 = vadd.f32 %v1218_v22, %v695_v0 }
 0x285   :  { %735 = vst [vmem:[#allocation2 + $0xd8] sm:$0xff] %v696_v1 }
 0x28a   :  { %v698_v2 = vpop.f32.mrf.mxu3 }
 0x28b   :  { %v699_v3 = vadd.f32 %v1218_v22, %v698_v2 }
 0x28d   :  { %736 = vst [vmem:[#allocation2 + $0xe0] sm:$0xff] %v699_v3 }
 0x292   :  { %v700_v4 = vpop.f32.mrf.mxu3 }
 0x293   :  { %v701_v5 = vadd.f32 %v1218_v22, %v700_v4 }
 0x295   :  { %737 = vst [vmem:[#allocation2 + $0xe8] sm:$0xff] %v701_v5 }
 0x29a   :  { %v703_v6 = vpop.f32.mrf.mxu3 }
 0x29b   :  { %v704_v7 = vadd.f32 %v1218_v22, %v703_v6 }
 0x29d   :  { %738 = vst [vmem:[#allocation2 + $0xf0] sm:$0xff] %v704_v7 }
 0x2a2   :  { %v705_v8 = vpop.f32.mrf.mxu3 }
 0x2a3   :  { %v706_v9 = vadd.f32 %v1218_v22, %v705_v8 }
 0x2a5   :  { %739 = vst [vmem:[#allocation2 + $0xf8] sm:$0xff] %v706_v9 }
 0x2a6   :  { %752 = dma.vmem_to_hbm [thread:$0]  %s745_s19, 4096, %s747_s22, [#allocation3], %s995_s23, %s995_s23, %s996_s24  }
 0x2a7   :  { %992 = dma.done.wait [#allocation3], 4096  }
 0x2a8   :  { %993 = vsyncadd [#allocation3], 4294963200 }
 0x2a9   :  { %757 = vsyncpa [#allocation3], 1 }

</bundles_post_ra>
